<compile_context>
chip_gen: v7x
topology: tpu7x:2x2x1
jax: 0.10.0
libtpu: 0.0.40
codegen_flags: <defaults>
</compile_context>

<pallas_src>
import functools

import jax
import jax.numpy as jnp
import numpy as np
from jax import lax
from jax.experimental import pallas as pl
from jax.experimental.pallas import tpu as pltpu


def _sam_kernel(x_ref, t_ref, o_ref, *, C, CB):
    """Processes NB images in lane-dense (NB, C_pad, HW_pad) layout.

    x_ref : VMEM (NB, C_pad, HWp)  input block (channels / spatial zero-padded)
    t_ref : VMEM (2*HWp, HWp)      stacked flat-Toeplitz conv operator [avg; max]
    o_ref : VMEM (NB, C_pad, HWp)  output block
    """
    NB, C_pad, HWp = x_ref.shape
    n_chunks = C_pad // CB
    unroll = n_chunks <= 8
    needs_mask = C_pad != C          # zero-padded channels must not win the max

    # ---- channel sum / max: elementwise (VPU) accumulation per CB-chunk; the
    # cross-sublane (XLU) reductions happen exactly once, after the loop. ----
    def reduce_body(i, carry):
        s, m = carry
        c0 = pl.multiple_of(i * CB, CB)
        chunk = x_ref[:, pl.ds(c0, CB), :].astype(jnp.float32)     # (NB, CB, HWp)
        if needs_mask:
            ch = c0 + lax.broadcasted_iota(jnp.int32, (NB, CB, HWp), 1)
            mchunk = jnp.where(ch < C, chunk, -jnp.inf)
        else:
            mchunk = chunk
        return s + chunk, jnp.maximum(m, mchunk)

    s0 = jnp.zeros((NB, CB, HWp), jnp.float32)
    m0 = jnp.full((NB, CB, HWp), -jnp.inf, jnp.float32)
    s, m = lax.fori_loop(0, n_chunks, reduce_body, (s0, m0), unroll=unroll)

    avg = jnp.sum(s, axis=1) * (1.0 / C)                            # (NB, HWp)
    mx = jnp.max(m, axis=1)                                         # (NB, HWp)

    # ---- 7x7 'same' conv: ONE MXU matmul against the stacked Toeplitz op.
    # LHS rows are [avg | max]; default MXU precision, f32 operator, f32 acc. ----
    lhs = jnp.concatenate([avg, mx], axis=-1)                       # (NB, 2*HWp)
    y = jnp.dot(lhs, t_ref[...], preferred_element_type=jnp.float32)
    att = jax.nn.sigmoid(y)                                         # (NB, HWp)

    # Broadcast hoisted out of the rescale loop (JAX does not CSE
    # broadcast_in_dim) and cast once to the output dtype so the multiply runs
    # at native width (bf16 on v6e/v7x when x is bf16).
    att_b = jnp.broadcast_to(att[:, None, :], (NB, CB, HWp)).astype(o_ref.dtype)

    # ---- rescale x chunk by chunk: lane-dense loads, multiplies and stores ----
    def scale_body(i, carry):
        c0 = pl.multiple_of(i * CB, CB)
        xc = x_ref[:, pl.ds(c0, CB), :]
        o_ref[:, pl.ds(c0, CB), :] = (xc * att_b).astype(o_ref.dtype)
        return carry

    lax.fori_loop(0, n_chunks, scale_body, 0, unroll=unroll)


def _conv_to_flat_toeplitz(conv_weight, H, W, HW_pad):
    """Build T (2*HW_pad, HW_pad) such that y_flat = [avg_flat | max_flat] @ T.

    Rows 0..HW-1 carry the avg-channel taps, rows HW_pad..HW_pad+HW-1 the
    max-channel taps; zero 'same' padding and the HW->HW_pad lane padding are
    baked in as zero rows/cols.  Index bookkeeping is static numpy; only the
    weight gather is traced."""
    K = conv_weight.shape[-1]
    pad = K // 2
    HW = H * W
    pos = np.arange(HW)
    ri, rj = pos // W, pos % W                      # coordinates of a flat index
    dh = ri[:, None] - ri[None, :] + pad            # (HW, HW): rows=q(in), cols=p(out)
    dw = rj[:, None] - rj[None, :] + pad
    valid = (dh >= 0) & (dh < K) & (dw >= 0) & (dw < K)
    tap = np.where(valid, dh * K + dw, 0)           # indices into K*K taps
    w_flat = conv_weight.reshape(2, K * K).astype(jnp.float32)      # (2, K*K)
    t = jnp.where(valid[None, :, :], w_flat[:, tap], 0.0)           # (2, HW, HW)
    if HW_pad != HW:
        t = jnp.pad(t, ((0, 0), (0, HW_pad - HW), (0, HW_pad - HW)))
    return t.reshape(2 * HW_pad, HW_pad)


def spatial_attention_module(x, conv_weight):
    """x: (N, C, H, W); conv_weight: (1, 2, K, K) (PyTorch OIHW, bias=False)."""
    N, C, H, W = x.shape
    HW = H * W

    # Lane-align the spatial axis, sublane-align the channel axis.
    HW_pad = ((HW + 127) // 128) * 128
    C_pad = C if C % 8 == 0 else ((C + 7) // 8) * 8
    # Large channel chunk (multiple of 8): few loop iterations, fewer bundles.
    CB = max(cb for cb in (64, 32, 16, 8) if C_pad % cb == 0)

    T = _conv_to_flat_toeplitz(conv_weight, H, W, HW_pad)   # (2*HW_pad, HW_pad) f32

    x_flat = x.reshape(N, C, HW)
    if C_pad != C or HW_pad != HW:
        # Zero padding is correct for the channel sum (we divide by the true C)
        # and for the spatial conv (the matching T rows/cols are zero); the
        # channel max is protected by the in-kernel -inf mask.
        x_flat = jnp.pad(x_flat, ((0, 0), (0, C_pad - C), (0, HW_pad - HW)))

    # ---- VMEM budget from the actual device (no hard 48 MiB cap). ----
    try:
        vmem_cap = int(pltpu.get_tpu_info().vmem_capacity_bytes)
    except Exception:  # conservative fallback that fits every generation (v7x: 64 MiB)
        vmem_cap = 64 << 20
    vmem_budget = int(vmem_cap) * 3 // 4

    itemsize = x.dtype.itemsize
    per_img = C_pad * HW_pad * itemsize          # one (C_pad, HW_pad) image slab
    t_bytes = T.size * T.dtype.itemsize
    intern = 4 * CB * HW_pad * 4                 # loop accumulators / chunk / att_b
    fixed = 2 * t_bytes + (4 << 20)              # count T twice + slack (safety margin)
    per_nb = 4 * per_img + intern                # in + out, double-buffered
    max_nb = max(1, (vmem_budget - fixed) // per_nb)
    if N >= 2:
        max_nb = min(max_nb, max(1, N // 2))     # keep grid >= 2: both v7x TCs get work
    max_nb = min(max_nb, N)
    NB = max(d for d in range(1, int(max_nb) + 1) if N % d == 0)

    kernel = functools.partial(_sam_kernel, C=C, CB=CB)

    out_flat = pl.pallas_call(
        kernel,
        out_shape=jax.ShapeDtypeStruct((N, C_pad, HW_pad), x.dtype),
        grid=(N // NB,),
        in_specs=[
            # NB images per grid step, lane-dense (NB, C_pad, HW_pad) tile.
            pl.BlockSpec((NB, C_pad, HW_pad), lambda n: (n, 0, 0)),
            # Toeplitz operator: constant index_map + single-buffered, so it is
            # DMA'd once and stays resident without a second pipeline buffer.
            pl.BlockSpec((2 * HW_pad, HW_pad), lambda n: (0, 0),
                         pipeline_mode=pl.Buffered(1)),
        ],
        out_specs=pl.BlockSpec((NB, C_pad, HW_pad), lambda n: (n, 0, 0)),
        compiler_params=pltpu.CompilerParams(
            dimension_semantics=("parallel",),   # batch blocks independent
            vmem_limit_bytes=int(vmem_budget),
        ),
    )(x_flat, T)

    return out_flat[:, :C, :HW].reshape(N, C, H, W)


def _reference(x, conv_weight):
    """Pure-JAX reference mirroring the PyTorch forward (f32 conv)."""
    avg = jnp.mean(x, axis=1, keepdims=True)
    mx = jnp.max(x, axis=1, keepdims=True)
    y = jnp.concatenate([avg, mx], axis=1)                          # (N,2,H,W)
    K = conv_weight.shape[-1]
    y = lax.conv_general_dilated(
        y, conv_weight,
        window_strides=(1, 1),
        padding=[(K // 2, K // 2), (K // 2, K // 2)],
        dimension_numbers=("NCHW", "OIHW", "NCHW"),
        precision=lax.Precision.HIGHEST)
    return x * jax.nn.sigmoid(y)


if __name__ == "__main__":
    key = jax.random.PRNGKey(0)
    kx, kw = jax.random.split(key)

    N, C, H, W = 2, 4, 16, 16
    K = 7

    x = jax.random.normal(kx, (N, C, H, W), dtype=jnp.float32)
    # nn.Conv2d(2, 1, 7, bias=False) weight: shape (1, 2, 7, 7).
    bound = 1.0 / np.sqrt(2 * K * K)
    conv_weight = jax.random.uniform(
        kw, (1, 2, K, K), minval=-bound, maxval=bound, dtype=jnp.float32)

    out = spatial_attention_module(x, conv_weight)
    out = jax.block_until_ready(out)

    ref = _reference(x, conv_weight)
    # Tolerance sized for a single-pass bf16 MXU matmul at default precision
    # (the channel reductions, sigmoid and rescale are exact f32):
    # |err| <~ 0.25 * |x| * bf16_eps * sqrt(98 taps) ~ 1e-3.
    np.testing.assert_allclose(np.asarray(out), np.asarray(ref), atol=2e-3, rtol=2e-3)

    print("KERNEL_OK")
</pallas_src>

<mosaic_0001>
module attributes {stable_mosaic.version = 11 : i64} {
  func.func @_sam_kernel(%arg0: i32, %arg1: memref<1x8x256xf32, #tpu.memory_space<vmem>>, %arg2: memref<512x256xf32, #tpu.memory_space<vmem>>, %arg3: memref<1x8x256xf32, #tpu.memory_space<vmem>>) attributes {dimension_semantics = [#tpu.dimension_semantics<parallel>], iteration_bounds = array<i64: 2>, scalar_prefetch = 0 : i64, scratch_operands = 0 : i64, tpu.core_type = #tpu.core_type<tc>, window_params = [{transform_indices = @transform_0, window_bounds = array<i64: 1, 8, 256>}, {pipeline_mode = #tpu.pipeline_mode<synchronous>, transform_indices = @transform_1, window_bounds = array<i64: 512, 256>}, {transform_indices = @transform_2, window_bounds = array<i64: 1, 8, 256>}]} {
    %cst = arith.constant 0.000000e+00 : f32
    %0 = vector.broadcast %cst : f32 to vector<1x8x256xf32>
    %cst_0 = arith.constant 0xFF800000 : f32
    %1 = vector.broadcast %cst_0 : f32 to vector<1x8x256xf32>
    %c0_i32 = arith.constant 0 : i32
    %c8_i32 = arith.constant 8 : i32
    %2 = arith.muli %c0_i32, %c8_i32 : i32
    %3 = tpu.assume_multiple %2, 8 : i32
    %c0 = arith.constant 0 : index
    %4 = arith.index_cast %3 : i32 to index
    %c0_1 = arith.constant 0 : index
    %5 = vector.load %arg1[%c0, %4, %c0_1] : memref<1x8x256xf32, #tpu.memory_space<vmem>>, vector<1x8x256xf32>
    %6 = tpu.iota {dimensions = array<i32: 1>} : vector<1x8x256xi32>
    %7 = vector.broadcast %3 : i32 to vector<1x8x256xi32>
    %8 = arith.addi %7, %6 : vector<1x8x256xi32>
    %c4_i32 = arith.constant 4 : i32
    %9 = vector.broadcast %c4_i32 : i32 to vector<1x8x256xi32>
    %10 = arith.cmpi slt, %8, %9 : vector<1x8x256xi32>
    %cst_2 = arith.constant 0xFF800000 : f32
    %11 = vector.broadcast %cst_2 : f32 to vector<1x8x256xf32>
    %12 = arith.select %10, %5, %11 : vector<1x8x256xi1>, vector<1x8x256xf32>
    %13 = arith.addf %0, %5 : vector<1x8x256xf32>
    %14 = arith.maximumf %1, %12 : vector<1x8x256xf32>
    %c1_i32 = arith.constant 1 : i32
    %cst_3 = arith.constant dense<0.000000e+00> : vector<1x256xf32>
    %15 = vector.multi_reduction <add>, %13, %cst_3 [1] : vector<1x8x256xf32> to vector<1x256xf32>
    %cst_4 = arith.constant 2.500000e-01 : f32
    %16 = vector.broadcast %cst_4 : f32 to vector<1x256xf32>
    %17 = arith.mulf %15, %16 : vector<1x256xf32>
    %cst_5 = arith.constant dense<0xFF800000> : vector<1x256xf32>
    %18 = vector.multi_reduction <maximumf>, %14, %cst_5 [1] : vector<1x8x256xf32> to vector<1x256xf32>
    %19 = tpu.concatenate %17, %18 in 1 : vector<1x256xf32>, vector<1x256xf32> -> vector<1x512xf32>
    %c0_6 = arith.constant 0 : index
    %c0_7 = arith.constant 0 : index
    %20 = vector.load %arg2[%c0_6, %c0_7] : memref<512x256xf32, #tpu.memory_space<vmem>>, vector<512x256xf32>
    %cst_8 = arith.constant dense<0.000000e+00> : vector<1x256xf32>
    %21 = tpu.matmul %19, %20, %cst_8 {dimension_numbers = #tpu.dot_dimension_numbers<[1], [0], [0], [1], [0, 0, 1, 1], [], []>} : vector<1x512xf32>, vector<512x256xf32>, vector<1x256xf32> -> vector<1x256xf32>
    %22 = arith.negf %21 : vector<1x256xf32>
    %23 = math.exp %22 : vector<1x256xf32>
    %cst_9 = arith.constant 1.000000e+00 : f32
    %24 = vector.broadcast %cst_9 : f32 to vector<1x256xf32>
    %25 = arith.addf %24, %23 : vector<1x256xf32>
    %26 = arith.divf %24, %25 : vector<1x256xf32>
    %27 = vector.shape_cast %26 : vector<1x256xf32> to vector<1x1x256xf32>
    %28 = vector.shape_cast %27 : vector<1x1x256xf32> to vector<1x1x256xf32>
    %29 = vector.broadcast %28 : vector<1x1x256xf32> to vector<1x8x256xf32>
    %c0_i32_10 = arith.constant 0 : i32
    %c8_i32_11 = arith.constant 8 : i32
    %30 = arith.muli %c0_i32_10, %c8_i32_11 : i32
    %31 = tpu.assume_multiple %30, 8 : i32
    %c0_12 = arith.constant 0 : index
    %32 = arith.index_cast %31 : i32 to index
    %c0_13 = arith.constant 0 : index
    %33 = vector.load %arg1[%c0_12, %32, %c0_13] : memref<1x8x256xf32, #tpu.memory_space<vmem>>, vector<1x8x256xf32>
    %34 = arith.mulf %33, %29 : vector<1x8x256xf32>
    %c0_14 = arith.constant 0 : index
    %35 = arith.index_cast %31 : i32 to index
    %c0_15 = arith.constant 0 : index
    %36 = vector.load %arg3[%c0_14, %35, %c0_15] : memref<1x8x256xf32, #tpu.memory_space<vmem>>, vector<1x8x256xf32>
    tpu.vector_store %arg3[%c0_14, %35, %c0_15], %34 {strides = array<i32>} : memref<1x8x256xf32, #tpu.memory_space<vmem>>, vector<1x8x256xf32>,
    %c1_i32_16 = arith.constant 1 : i32
    return
  }
  func.func @transform_0(%arg0: i32) -> (i32, i32, i32) {
    %c0_i32 = arith.constant 0 : i32
    %c0_i32_0 = arith.constant 0 : i32
    %c0_i32_1 = arith.constant 0 : i32
    return %arg0, %c0_i32, %c0_i32_0 : i32, i32, i32
  }
  func.func @transform_1(%arg0: i32) -> (i32, i32) {
    %c0_i32 = arith.constant 0 : i32
    %c0_i32_0 = arith.constant 0 : i32
    %c0_i32_1 = arith.constant 0 : i32
    return %c0_i32, %c0_i32_0 : i32, i32
  }
  func.func @transform_2(%arg0: i32) -> (i32, i32, i32) {
    %c0_i32 = arith.constant 0 : i32
    %c0_i32_0 = arith.constant 0 : i32
    %c0_i32_1 = arith.constant 0 : i32
    return %arg0, %c0_i32, %c0_i32_0 : i32, i32, i32
  }
}

</mosaic_0001>

<bundles_post_ra>
// kernel: tpu_custom_call.1
= control target key start
LH: loop header
LB: loop body
LE: loop exit
PB: predicated region body
PF: predicated region fallthrough
CT: control target
= control target key end

     0   :  { %7 = vsyncpa [#allocation3], 0  ;;  %s1197_s0 = inlined_call_operand.hbm [shape: f32[2,8,256], index: 0, kind: input, shape index: {}]   ;;  %s1198_s1 = inlined_call_operand.hbm [shape: f32[512,256], index: 1, kind: input, shape index: {}]   ;;  %s1199_s2 = inlined_call_operand.hbm [shape: f32[2,8,256], index: 2, kind: output, shape index: {}]  }
   0x1   :  { %9 = vsyncpa [#allocation3 + $0x1], 0 }
   0x2   :  { %10 = vsyncpa [#allocation6], 0 }
   0x3   :  { %11 = vsyncpa [#allocation4], 0 }
   0x4   :  { %13 = vsyncpa [#allocation4 + $0x1], 0  ;;  %s973_s9 = smov 0   ;;  %s975_s10 = smov 0  }
   0x5   :  { %s977_s11 = smov 0   ;;  %s979_s12 = smov 0  }
   0x6 LB: > { %s994_s13 = sadd.s32 4294967295, %s951_s12   ;;  %s606_s14 = sadd.s32 4294967294, %s951_s12   ;;  %s951_s12 = sphi %s979_s12, %s1219_s12   ;;  %s947_s11 = sphi %s977_s11, %s1218_s11   ;;  %s943_s10 = sphi %s975_s10, %s1217_s10   ;;  %s939_s9 = sphi %s973_s9, %s1216_s9  }
   0x7   : > { %p39_p0 = scmp.ne.s32.totalorder %s943_s10, %s939_s9  ;;  %p1200_p1 = scmp.eq.s32.totalorder %s994_s13, 0 }
   0x8   : > { %p90_p3 = scmp.eq.s32.totalorder %s606_s14, 1  ;;  %p607_p5 = scmp.ge.s32.totalorder %s951_s12, 1 }
   0x9   : > { %p1003_p4 = por %p1200_p1, %p39_p0  ;;  %p97_p7 = scmp.lt.s32.totalorder %s951_s12, 3 }
   0xa   : > { %p1008_p6 = por %p90_p3, %p39_p0  ;;  %s953_s18 = smov [#allocation5]  }
   0xb   : > { %s1203_s15 = scalar_select %p1003_p4, 1, 0 }
   0xc   : > { %s1204_s16 = scalar_select %p1008_p6, 1, 0 }
   0xd   : > { %p1013_p8 = pnand %p607_p5, %p97_p7  ;;  %s109_s19 = sshll.u32 %s953_s18, 4  ;;  %s1017_s19 = int_to_ptr.vmem [resolvable:$true] %s109_s19 }
   0xe   : > { %s1029_s21 = sadd.s32 1, %s951_s12   ;;  %s26_s22 = sadd.s32 1, %s947_s11 }
   0xf   : > { %s1205_s17 = scalar_select %p1013_p8, 1, 0 }
  0x10   : > { %p764_p9 = pneg %p1013_p8  ;;  %s23_s23 = ssub.s32 %s951_s12, %s1029_s21 }
  0x11   : > { %s823_s26 = scalar_lea.hbm %s1198_s1, 16384 }
  0x12   : > { %p1024_p11 = pnand %p764_p9, %p1200_p1  ;;  %p824_p12 = scmp.ne.s32.totalorder %s1198_s1, %s823_s26 }
  0x13   : > { %p830_p5 = scmp.lt.u32.totalorder %s823_s26, %s1198_s1 }
  0x14   : > { %p825_p13 = pneg %p1024_p11 }
  0x16   : > { %p826_p0 = pnand %p825_p13, %p824_p12 }
  0x18   : > { %p827_p3 = pneg %p826_p0 }
  0x1a   : > { %p832_p7 = pnand %p830_p5, %p827_p3 }
  0x1c   : > { %835 = shalt.err (!%p832_p7)
}
  0x1d   : > { %s836_s3 = scalar_lea.vmem %s1017_s19, 16384  ;;  %p844_p2 = scmp.lt.s32.totalorder %s1017_s19, %s1017_s19 }
  0x1e   : > { %p837_p9 = scmp.ne.s32.totalorder %s1017_s19, %s836_s3  ;;  %p845_p6 = scmp.lt.s32.totalorder %s836_s3, %s836_s3 }
  0x20   : > { %p839_p10 = pnand %p837_p9, %p825_p13  ;;  %p846_p4 = por %p845_p6, %p844_p2 }
  0x22   : > { %p840_p1 = pneg %p839_p10 }
  0x24   : > { %p847_p8 = pnand %p846_p4, %p840_p1 }
  0x26   : > { %850 = shalt.err (!%p847_p8)
}
  0x27   : > { %s954_s4 = smov 256   ;;  %s955_s5 = smov 16  }
  0x28   : > { %767 = dma.hbm_to_vmem [thread:$0]  (!%p1024_p11), %s1198_s1, 16384, %s1017_s19, [#allocation6], %s954_s4, %s954_s4, %s955_s5  }
  0x29   : > { %p24_p2 = scmp.eq.s32.totalorder %s23_s23, 0  ;;  %p33_p1 = scmp.ne.s32.totalorder %s947_s11, %s943_s10 }
  0x2a   : > { %p34_p4 = scmp.eq.s32.totalorder %s951_s12, 0  ;;  %p777_p6 = scmp.lt.s32.totalorder %s951_s12, 2 }
  0x2b   : > { %s1060_s8 = scalar_select %p24_p2, %s947_s11, %s26_s22  }
  0x2c   : > { %p35_p8 = por %p34_p4, %p33_p1  ;;  %p1207_p10 = scmp.eq.s32.totalorder %s994_s13, 1 }
  0x2d   : > { %s123_s18 = sand.u32 1, %s947_s11   ;;  %s624_s24 = sshll.u32 %s951_s12, 8 }
  0x2e   : > { %p1064_p12 = por %p1207_p10, %p33_p1  ;;  %s610_s25 = sshll.u32 %s123_s18, 4 }
  0x2f   : > { %s1073_s27 = scalar_lea.hbm %s1197_s0, %s624_s24  ;;  %s127_s19 = scalar_lea.vmem [#allocation2], %s610_s25 }
  0x30   : > { %s135_s22 = sshll.u32 %s127_s19, 4  ;;  %p1075_p11 = pnand %p777_p6, %p35_p8  ;;  %s1079_s22 = int_to_ptr.vmem [resolvable:$true] %s135_s22 }
  0x31   : > { %s124_s28 = scalar_lea.sflag [#allocation3], %s123_s18  ;;  %s851_s29 = scalar_lea.hbm %s1073_s27, 256 }
  0x32   : > { %p852_p13 = scmp.ne.s32.totalorder %s1073_s27, %s851_s29  ;;  %p853_p0 = pneg %p1075_p11 }
  0x33   : > { %s856_s4 = scalar_lea.hbm %s1197_s0, 512  ;;  %p857_p7 = scmp.lt.u32.totalorder %s1073_s27, %s1197_s0 }
  0x34   : > { %p854_p3 = pnand %p853_p0, %p852_p13  ;;  %p858_p9 = scmp.lt.u32.totalorder %s856_s4, %s851_s29 }
  0x35   : > { %p860_p1 = scmp.lt.u32.totalorder %s851_s29, %s1073_s27 }
  0x36   : > { %p855_p5 = pneg %p854_p3  ;;  %p859_p2 = por %p858_p9, %p857_p7 }
  0x38   : > { %p861_p4 = por %p860_p1, %p859_p2 }
  0x3a   : > { %p862_p6 = pnand %p861_p4, %p855_p5 }
  0x3c   : > { %865 = shalt.err (!%p862_p6)
}
  0x3d   : > { %s866_s7 = scalar_lea.vmem %s1079_s22, 256  ;;  %s956_s18 = smov [#allocation2]  }
  0x3e   : > { %p867_p8 = scmp.ne.s32.totalorder %s1079_s22, %s866_s7  ;;  %s871_s24 = sshll.u32 %s956_s18, 4  ;;  %s872_s24 = int_to_ptr.vmem [resolvable:$false] %s871_s24 }
  0x3f   : > { %s873_s25 = scalar_lea.vmem %s872_s24, 512  ;;  %p874_p3 = scmp.lt.s32.totalorder %s1079_s22, %s872_s24 }
  0x40   : > { %p869_p10 = pnand %p867_p8, %p853_p0  ;;  %p875_p7 = scmp.lt.s32.totalorder %s873_s25, %s866_s7 }
  0x42   : > { %p870_p13 = pneg %p869_p10  ;;  %p876_p9 = por %p875_p7, %p874_p3 }
  0x44   : > { %p877_p2 = pnand %p876_p9, %p870_p13 }
  0x46   : > { %880 = shalt.err (!%p877_p2)
}
  0x47   : > { %771 = dma.hbm_to_vmem [thread:$0]  (!%p1075_p11), %s1073_s27, 256, %s1079_s22, %s124_s28  }
  0x48   : > { %p1210_p5 = scmp.ne.s32.totalorder %s1205_s17, 0 }
  0x49   : > { %s1109_s20 = sand.u32 (!%p1210_p5), 1, %s943_s10   ;;  %p1211_p0 = scmp.ne.s32.totalorder (!%p1210_p5), %s1203_s15, 0 }
  0x4a   : > { %144 = sbr.rel (%p1210_p5) target bundleno = 413 (0x19d), region = 28  ;;  %s614_s26 = sshll.u32 (!%p1210_p5), %s1109_s20, 4 }
  0x4b   : > { %s147_s19 = scalar_lea.sflag (!%p1210_p5), [#allocation3], %s1109_s20  ;;  %s1115_s29 = scalar_lea.vmem (!%p1210_p5), [#allocation2], %s614_s26 }
  0x51   : > { %926 = dma.done.wait (%p1211_p0), %s147_s19, 256  }
  0x52   : > { %928 = vsyncadd (%p1211_p0), %s147_s19, 4294967040  ;;  %p1212_p11 = scmp.eq.s32.totalorder %s994_s13, 0 }
  0x54   : > { %930 = dma.done.wait (%p1212_p11), [#allocation6], 16384   ;;  %p1213_p1 = pmov %p1212_p11 }
  0x55   : > { %v216_v0 = vld [vmem:[#allocation5 + $0x8] sm:$0xff]  ;;  %v218_v1 = vld [vmem:[#allocation5 + $0x18] sm:$0xff]  ;;  %v215_v5 = vld [vmem:[#allocation5] sm:$0xff]  ;;  %s625_s15 = sshll.u32 %s994_s13, 8  ;;  %s174_s17 = scalar_lea.vmem [#allocation7], %s614_s26 }
  0x56   : > { %932 = vsyncadd (%p1213_p1), [#allocation6], 4294950912  ;;  %v280_v2 = vld [vmem:[#allocation5 + $0x208] sm:$0xff]  ;;  %v626_v3 = vpack.c.bf16 %v218_v1, %v216_v0  ;;  %v282_v4 = vld [vmem:[#allocation5 + $0x218] sm:$0xff]  ;;  %s526_s27 = sshll.u32 %s174_s17, 4  ;;  %s1153_s28 = scalar_lea.hbm %s1199_s2, %s625_s15  ;;  %s1155_s27 = int_to_ptr.vmem [resolvable:$true] %s526_s27 }
  0x57   : > { %v217_v6 = vld [vmem:[#allocation5 + $0x10] sm:$0xff]  ;;  %v690_v7 = vpack.c.bf16 %v282_v4, %v280_v2  ;;  %v279_v9 = vld [vmem:[#allocation5 + $0x200] sm:$0xff]  ;;  %v220_v11 = vld [vmem:[#allocation5 + $0x28] sm:$0xff]  ;;  %s512_s13 = scalar_lea.sflag [#allocation4], %s1109_s20  ;;  %s881_s30 = scalar_lea.vmem %s1155_s27, 256 }
  0x58   : > { %v628_v8 = vpack.c.bf16 %v217_v6, %v215_v5  ;;  %v281_v10 = vld [vmem:[#allocation5 + $0x210] sm:$0xff]  ;;  %627 = vmatprep.subr.bf16.mxu1 %v626_v3  ;;  %v222_v13 = vld [vmem:[#allocation5 + $0x38] sm:$0xff]  ;;  %v284_v14 = vld [vmem:[#allocation5 + $0x228] sm:$0xff]  ;;  %p882_p4 = scmp.ne.s32.totalorder %s1155_s27, %s881_s30  ;;  %s957_s3 = smov [#allocation7]  }
  0x59   : > { %v692_v12 = vpack.c.bf16 %v281_v10, %v279_v9  ;;  %v286_v15 = vld [vmem:[#allocation5 + $0x238] sm:$0xff]  ;;  %691 = vmatprep.subr.bf16.mxu0 %v690_v7  ;;  %v630_v16 = vpack.c.bf16 %v222_v13, %v220_v11  ;;  %v219_v18 = vld [vmem:[#allocation5 + $0x20] sm:$0xff]  ;;  %v221_v19 = vld [vmem:[#allocation5 + $0x30] sm:$0xff]  ;;  %s885_s4 = sshll.u32 %s957_s3, 4  ;;  %s886_s4 = int_to_ptr.vmem [resolvable:$false] %s885_s4 }
  0x5a   : > { %629 = vmatpush1.bf16.msra.mxu1 %v628_v8  ;;  %v694_v17 = vpack.c.bf16 %v286_v15, %v284_v14  ;;  %v283_v20 = vld [vmem:[#allocation5 + $0x220] sm:$0xff]  ;;  %v632_v21 = vpack.c.bf16 %v221_v19, %v219_v18  ;;  %v285_v22 = vld [vmem:[#allocation5 + $0x230] sm:$0xff]  ;;  %v224_v23 = vld [vmem:[#allocation5 + $0x48] sm:$0xff]  ;;  %p883_p6 = pnand %p882_p4, %p1064_p12  ;;  %s887_s5 = scalar_lea.vmem %s886_s4, 512 }
  0x5b   : > { %693 = vmatpush1.bf16.msra.mxu0 %v692_v12  ;;  %v226_v24 = vld [vmem:[#allocation5 + $0x58] sm:$0xff]  ;;  %631 = vmatprep.subr.bf16.mxu1 %v630_v16  ;;  %v696_v25 = vpack.c.bf16 %v285_v22, %v283_v20  ;;  %v288_v27 = vld [vmem:[#allocation5 + $0x248] sm:$0xff]  ;;  %v223_v29 = vld [vmem:[#allocation5 + $0x40] sm:$0xff]  ;;  %p888_p10 = scmp.lt.s32.totalorder %s1155_s27, %s886_s4  ;;  %p889_p13 = scmp.lt.s32.totalorder %s887_s5, %s881_s30 }
  0x5c   : > { %695 = vmatprep.subr.bf16.mxu0 %v694_v17  ;;  %v634_v26 = vpack.c.bf16 %v226_v24, %v224_v23  ;;  %v290_v28 = vld [vmem:[#allocation5 + $0x258] sm:$0xff]  ;;  %v225_v31 = vld [vmem:[#allocation5 + $0x50] sm:$0xff]  ;;  %v287_v32 = vld [vmem:[#allocation5 + $0x240] sm:$0xff]  ;;  %p884_p8 = pneg %p883_p6 }
  0x5d   : > { %v698_v30 = vpack.c.bf16 %v290_v28, %v288_v27  ;;  %v289_v33 = vld [vmem:[#allocation5 + $0x250] sm:$0xff]  ;;  %v636_v34 = vpack.c.bf16 %v225_v31, %v223_v29  ;;  %v228_v35 = vld [vmem:[#allocation5 + $0x68] sm:$0xff]  ;;  %v230_v36 = vld [vmem:[#allocation5 + $0x78] sm:$0xff]  ;;  %p890_p3 = por %p889_p13, %p888_p10 }
  0x5e   : > { %633 = vmatpush1.bf16.msra.mxu1 %v632_v21  ;;  %v292_v37 = vld [vmem:[#allocation5 + $0x268] sm:$0xff]  ;;  %v700_v38 = vpack.c.bf16 %v289_v33, %v287_v32  ;;  %v638_v39 = vpack.c.bf16 %v230_v36, %v228_v35  ;;  %v294_v40 = vld [vmem:[#allocation5 + $0x278] sm:$0xff]  ;;  %v227_v41 = vld [vmem:[#allocation5 + $0x60] sm:$0xff] }
  0x5f   : > { %697 = vmatpush1.bf16.msra.mxu0 %v696_v25  ;;  %635 = vmatprep.subr.bf16.mxu1 %v634_v26  ;;  %v229_v42 = vld [vmem:[#allocation5 + $0x70] sm:$0xff]  ;;  %v702_v43 = vpack.c.bf16 %v294_v40, %v292_v37  ;;  %v291_v44 = vld [vmem:[#allocation5 + $0x260] sm:$0xff]  ;;  %v232_v46 = vld [vmem:[#allocation5 + $0x88] sm:$0xff]  ;;  %p891_p7 = pnand %p890_p3, %p884_p8 }
  0x60   : > { %699 = vmatprep.subr.bf16.mxu0 %v698_v30  ;;  %v293_v45 = vld [vmem:[#allocation5 + $0x270] sm:$0xff]  ;;  %v234_v47 = vld [vmem:[#allocation5 + $0x98] sm:$0xff]  ;;  %v296_v48 = vld [vmem:[#allocation5 + $0x288] sm:$0xff]  ;;  %v640_v50 = vpack.c.bf16 %v229_v42, %v227_v41 }
  0x61   : > { %v298_v49 = vld [vmem:[#allocation5 + $0x298] sm:$0xff]  ;;  %v704_v51 = vpack.c.bf16 %v293_v45, %v291_v44  ;;  %v642_v52 = vpack.c.bf16 %v234_v47, %v232_v46  ;;  %v231_v53 = vld [vmem:[#allocation5 + $0x80] sm:$0xff]  ;;  %v233_v54 = vld [vmem:[#allocation5 + $0x90] sm:$0xff]  ;;  %v180_v47 = vlaneseq }
  0x62   : > { %637 = vmatpush1.bf16.msra.mxu1 %v636_v34  ;;  %v295_v55 = vld [vmem:[#allocation5 + $0x280] sm:$0xff]  ;;  %v706_v56 = vpack.c.bf16 %v298_v49, %v296_v48  ;;  %v297_v57 = vld [vmem:[#allocation5 + $0x290] sm:$0xff]  ;;  %v236_v58 = vld [vmem:[#allocation5 + $0xa8] sm:$0xff]  ;;  %v644_v62 = vpack.c.bf16 %v233_v54, %v231_v53 }
  0x63   : > { %701 = vmatpush1.bf16.msra.mxu0 %v700_v38  ;;  %639 = vmatprep.subr.bf16.mxu1 %v638_v39  ;;  %v238_v59 = vld [vmem:[#allocation5 + $0xb8] sm:$0xff]  ;;  %v300_v60 = vld [vmem:[#allocation5 + $0x2a8] sm:$0xff]  ;;  %v708_v63 = vpack.c.bf16 %v297_v57, %v295_v55  ;;  %v235_v1 = vld [vmem:[#allocation5 + $0xa0] sm:$0xff] }
  0x64   : > { %703 = vmatprep.subr.bf16.mxu0 %v702_v43  ;;  %v302_v61 = vld [vmem:[#allocation5 + $0x2b8] sm:$0xff]  ;;  %v646_v0 = vpack.c.bf16 %v238_v59, %v236_v58  ;;  %v237_v2 = vld [vmem:[#allocation5 + $0xb0] sm:$0xff]  ;;  %v299_v3 = vld [vmem:[#allocation5 + $0x2a0] sm:$0xff] }
  0x65   : > { %v710_v4 = vpack.c.bf16 %v302_v61, %v300_v60  ;;  %v301_v5 = vld [vmem:[#allocation5 + $0x2b0] sm:$0xff]  ;;  %v240_v6 = vld [vmem:[#allocation5 + $0xc8] sm:$0xff]  ;;  %v242_v7 = vld [vmem:[#allocation5 + $0xd8] sm:$0xff]  ;;  %v648_v10 = vpack.c.bf16 %v237_v2, %v235_v1  ;;  %v1125_v60 = vshrl.u32 %v180_v47, 7 }
  0x66   : > { %641 = vmatpush1.bf16.msra.mxu1 %v640_v50  ;;  %v304_v8 = vld [vmem:[#allocation5 + $0x2c8] sm:$0xff]  ;;  %v306_v9 = vld [vmem:[#allocation5 + $0x2d8] sm:$0xff]  ;;  %v712_v11 = vpack.c.bf16 %v301_v5, %v299_v3  ;;  %v650_v12 = vpack.c.bf16 %v242_v7, %v240_v6  ;;  %v239_v13 = vld [vmem:[#allocation5 + $0xc0] sm:$0xff] }
  0x67   : > { %705 = vmatpush1.bf16.msra.mxu0 %v704_v51  ;;  %643 = vmatprep.subr.bf16.mxu1 %v642_v52  ;;  %v241_v14 = vld [vmem:[#allocation5 + $0xd0] sm:$0xff]  ;;  %v303_v15 = vld [vmem:[#allocation5 + $0x2c0] sm:$0xff]  ;;  %v714_v16 = vpack.c.bf16 %v306_v9, %v304_v8  ;;  %v244_v18 = vld [vmem:[#allocation5 + $0xe8] sm:$0xff]  ;;  %vm184_vm0 = vcmp.lt.s32.totalorder %v1125_v60, 4 }
  0x68   : > { %707 = vmatprep.subr.bf16.mxu0 %v706_v56  ;;  %v305_v17 = vld [vmem:[#allocation5 + $0x2d0] sm:$0xff]  ;;  %v246_v19 = vld [vmem:[#allocation5 + $0xf8] sm:$0xff]  ;;  %v308_v20 = vld [vmem:[#allocation5 + $0x2e8] sm:$0xff]  ;;  %v652_v22 = vpack.c.bf16 %v241_v14, %v239_v13 }
  0x69   : > { %v310_v21 = vld [vmem:[#allocation5 + $0x2f8] sm:$0xff]  ;;  %v716_v23 = vpack.c.bf16 %v305_v17, %v303_v15  ;;  %v654_v24 = vpack.c.bf16 %v246_v19, %v244_v18  ;;  %v243_v25 = vld [vmem:[#allocation5 + $0xe0] sm:$0xff]  ;;  %v245_v26 = vld [vmem:[#allocation5 + $0xf0] sm:$0xff] }
  0x6a   : > { %645 = vmatpush1.bf16.msra.mxu1 %v644_v62  ;;  %v307_v27 = vld [vmem:[#allocation5 + $0x2e0] sm:$0xff]  ;;  %v718_v28 = vpack.c.bf16 %v310_v21, %v308_v20  ;;  %v309_v29 = vld [vmem:[#allocation5 + $0x2f0] sm:$0xff]  ;;  %v248_v30 = vld [vmem:[#allocation5 + $0x108] sm:$0xff]  ;;  %v656_v34 = vpack.c.bf16 %v245_v26, %v243_v25 }
  0x6b   : > { %709 = vmatpush1.bf16.msra.mxu0 %v708_v63  ;;  %647 = vmatprep.subr.bf16.mxu1 %v646_v0  ;;  %v250_v31 = vld [vmem:[#allocation5 + $0x118] sm:$0xff]  ;;  %v312_v32 = vld [vmem:[#allocation5 + $0x308] sm:$0xff]  ;;  %v720_v35 = vpack.c.bf16 %v309_v29, %v307_v27  ;;  %v247_v37 = vld [vmem:[#allocation5 + $0x100] sm:$0xff] }
  0x6c   : > { %711 = vmatprep.subr.bf16.mxu0 %v710_v4  ;;  %v314_v33 = vld [vmem:[#allocation5 + $0x318] sm:$0xff]  ;;  %v658_v36 = vpack.c.bf16 %v250_v31, %v248_v30  ;;  %v249_v38 = vld [vmem:[#allocation5 + $0x110] sm:$0xff]  ;;  %v311_v39 = vld [vmem:[#allocation5 + $0x300] sm:$0xff] }
  0x6d   : > { %v722_v40 = vpack.c.bf16 %v314_v33, %v312_v32  ;;  %v313_v41 = vld [vmem:[#allocation5 + $0x310] sm:$0xff]  ;;  %v252_v42 = vld [vmem:[#allocation5 + $0x128] sm:$0xff]  ;;  %v254_v43 = vld [vmem:[#allocation5 + $0x138] sm:$0xff]  ;;  %v660_v46 = vpack.c.bf16 %v249_v38, %v247_v37 }
  0x6e   : > { %649 = vmatpush1.bf16.msra.mxu1 %v648_v10  ;;  %v316_v44 = vld [vmem:[#allocation5 + $0x328] sm:$0xff]  ;;  %v318_v45 = vld [vmem:[#allocation5 + $0x338] sm:$0xff]  ;;  %v724_v48 = vpack.c.bf16 %v313_v41, %v311_v39  ;;  %v662_v49 = vpack.c.bf16 %v254_v43, %v252_v42  ;;  %v251_v50 = vld [vmem:[#allocation5 + $0x120] sm:$0xff] }
  0x6f   : > { %713 = vmatpush1.bf16.msra.mxu0 %v712_v11  ;;  %651 = vmatprep.subr.bf16.mxu1 %v650_v12  ;;  %v253_v51 = vld [vmem:[#allocation5 + $0x130] sm:$0xff]  ;;  %v315_v52 = vld [vmem:[#allocation5 + $0x320] sm:$0xff]  ;;  %v726_v53 = vpack.c.bf16 %v318_v45, %v316_v44  ;;  %v256_v55 = vld [vmem:[#allocation5 + $0x148] sm:$0xff] }
  0x70   : > { %715 = vmatprep.subr.bf16.mxu0 %v714_v16  ;;  %v317_v54 = vld [vmem:[#allocation5 + $0x330] sm:$0xff]  ;;  %v258_v56 = vld [vmem:[#allocation5 + $0x158] sm:$0xff]  ;;  %v320_v57 = vld [vmem:[#allocation5 + $0x348] sm:$0xff]  ;;  %v664_v59 = vpack.c.bf16 %v253_v51, %v251_v50 }
  0x71   : > { %v322_v58 = vld [vmem:[#allocation5 + $0x358] sm:$0xff]  ;;  %v728_v61 = vpack.c.bf16 %v317_v54, %v315_v52  ;;  %v666_v62 = vpack.c.bf16 %v258_v56, %v256_v55  ;;  %v255_v63 = vld [vmem:[#allocation5 + $0x140] sm:$0xff]  ;;  %v257_v0 = vld [vmem:[#allocation5 + $0x150] sm:$0xff] }
  0x72   : > { %653 = vmatpush1.bf16.msra.mxu1 %v652_v22  ;;  %v319_v1 = vld [vmem:[#allocation5 + $0x340] sm:$0xff]  ;;  %v730_v2 = vpack.c.bf16 %v322_v58, %v320_v57  ;;  %v321_v3 = vld [vmem:[#allocation5 + $0x350] sm:$0xff]  ;;  %v260_v4 = vld [vmem:[#allocation5 + $0x168] sm:$0xff]  ;;  %v668_v8 = vpack.c.bf16 %v257_v0, %v255_v63 }
  0x73   : > { %717 = vmatpush1.bf16.msra.mxu0 %v716_v23  ;;  %655 = vmatprep.subr.bf16.mxu1 %v654_v24  ;;  %v262_v5 = vld [vmem:[#allocation5 + $0x178] sm:$0xff]  ;;  %v324_v6 = vld [vmem:[#allocation5 + $0x368] sm:$0xff]  ;;  %v259_v9 = vld [vmem:[#allocation5 + $0x160] sm:$0xff]  ;;  %v732_v10 = vpack.c.bf16 %v321_v3, %v319_v1 }
  0x74   : > { %719 = vmatprep.subr.bf16.mxu0 %v718_v28  ;;  %v326_v7 = vld [vmem:[#allocation5 + $0x378] sm:$0xff]  ;;  %v670_v11 = vpack.c.bf16 %v262_v5, %v260_v4  ;;  %v261_v12 = vld [vmem:[#allocation5 + $0x170] sm:$0xff]  ;;  %v323_v13 = vld [vmem:[#allocation5 + $0x360] sm:$0xff] }
  0x75   : > { %v325_v14 = vld [vmem:[#allocation5 + $0x370] sm:$0xff]  ;;  %v734_v15 = vpack.c.bf16 %v326_v7, %v324_v6  ;;  %v264_v16 = vld [vmem:[#allocation5 + $0x188] sm:$0xff]  ;;  %v266_v17 = vld [vmem:[#allocation5 + $0x198] sm:$0xff]  ;;  %v672_v24 = vpack.c.bf16 %v261_v12, %v259_v9 }
  0x76   : > { %657 = vmatpush1.bf16.msra.mxu1 %v656_v34  ;;  %v1129_v18 = vld [vmem:[%s1115_s29 + $0x8] sm:$0xff]  ;;  %v1133_v22 = vld [vmem:[%s1115_s29] sm:$0xff]  ;;  %v736_v28 = vpack.c.bf16 %v325_v14, %v323_v13  ;;  %v674_v29 = vpack.c.bf16 %v266_v17, %v264_v16 }
  0x77   : > { %721 = vmatpush1.bf16.msra.mxu0 %v720_v35  ;;  %659 = vmatprep.subr.bf16.mxu1 %v658_v36  ;;  %v328_v19 = vld [vmem:[#allocation5 + $0x388] sm:$0xff]  ;;  %v330_v20 = vld [vmem:[#allocation5 + $0x398] sm:$0xff]  ;;  %v195_v21 = vrot.slane %v1129_v18, 4  ;;  %v186_v23 = vsel %vm184_vm0, %v1129_v18, -inf  ;;  %v185_v25 = vsel %vm184_vm0, %v1133_v22, -inf  ;;  %v189_v27 = vrot.slane %v1133_v22, 4 }
  0x78   : > { %723 = vmatprep.subr.bf16.mxu0 %v722_v40  ;;  %v209_v26 = vrot.slane %v186_v23, 4  ;;  %v263_v30 = vld [vmem:[#allocation5 + $0x180] sm:$0xff]  ;;  %v265_v31 = vld [vmem:[#allocation5 + $0x190] sm:$0xff]  ;;  %v203_v34 = vrot.slane %v185_v25, 4  ;;  %v738_v35 = vpack.c.bf16 %v330_v20, %v328_v19  ;;  %v268_v37 = vld [vmem:[#allocation5 + $0x1a8] sm:$0xff] }
  0x79   : > { %v327_v32 = vld [vmem:[#allocation5 + $0x380] sm:$0xff]  ;;  %v196_v33 = vadd.f32 %v195_v21, %v1129_v18  ;;  %v329_v36 = vld [vmem:[#allocation5 + $0x390] sm:$0xff]  ;;  %v270_v38 = vld [vmem:[#allocation5 + $0x1b8] sm:$0xff]  ;;  %v190_v40 = vadd.f32 %v189_v27, %v1133_v22  ;;  %v676_v44 = vpack.c.bf16 %v265_v31, %v263_v30 }
  0x7a   : > { %661 = vmatpush1.bf16.msra.mxu1 %v660_v46  ;;  %v210_v39 = vmax.f32 %v186_v23, %v209_v26  ;;  %v332_v41 = vld [vmem:[#allocation5 + $0x3a8] sm:$0xff]  ;;  %v334_v42 = vld [vmem:[#allocation5 + $0x3b8] sm:$0xff]  ;;  %v204_v47 = vmax.f32 %v185_v25, %v203_v34  ;;  %v267_v50 = vld [vmem:[#allocation5 + $0x1a0] sm:$0xff] }
  0x7b   : > { %725 = vmatpush1.bf16.msra.mxu0 %v724_v48  ;;  %663 = vmatprep.subr.bf16.mxu1 %v662_v49  ;;  %v197_v43 = vrot.slane %v196_v33, 2  ;;  %v191_v46 = vrot.slane %v190_v40, 2  ;;  %v740_v48 = vpack.c.bf16 %v329_v36, %v327_v32  ;;  %v678_v49 = vpack.c.bf16 %v270_v38, %v268_v37  ;;  %v269_v51 = vld [vmem:[#allocation5 + $0x1b0] sm:$0xff]  ;;  %v331_v52 = vld [vmem:[#allocation5 + $0x3a0] sm:$0xff]  ;;  %v272_v56 = vld [vmem:[#allocation5 + $0x1c8] sm:$0xff] }
  0x7c   : > { %727 = vmatprep.subr.bf16.mxu0 %v726_v53  ;;  %v211_v45 = vrot.slane %v210_v39, 2  ;;  %v742_v54 = vpack.c.bf16 %v334_v42, %v332_v41  ;;  %v333_v55 = vld [vmem:[#allocation5 + $0x3b0] sm:$0xff]  ;;  %v274_v57 = vld [vmem:[#allocation5 + $0x1d8] sm:$0xff]  ;;  %v680_v0 = vpack.c.bf16 %v269_v51, %v267_v50  ;;  %v271_v5 = vld [vmem:[#allocation5 + $0x1c0] sm:$0xff] }
  0x7d   : > { %v198_v53 = vadd.f32 %v197_v43, %v196_v33  ;;  %v192_v63 = vadd.f32 %v191_v46, %v190_v40  ;;  %v744_v3 = vpack.c.bf16 %v333_v55, %v331_v52  ;;  %v682_v4 = vpack.c.bf16 %v274_v57, %v272_v56  ;;  %v273_v6 = vld [vmem:[#allocation5 + $0x1d0] sm:$0xff]  ;;  %v335_v7 = vld [vmem:[#allocation5 + $0x3c0] sm:$0xff]  ;;  %v278_v12 = vld [vmem:[#allocation5 + $0x1f8] sm:$0xff] }
  0x7e   : > { %665 = vmatpush1.bf16.msra.mxu1 %v664_v59  ;;  %v212_v58 = vmax.f32 %v210_v39, %v211_v45  ;;  %v336_v59 = vld [vmem:[#allocation5 + $0x3c8] sm:$0xff]  ;;  %v684_v19 = vpack.c.bf16 %v273_v6, %v271_v5  ;;  %v277_v25 = vld [vmem:[#allocation5 + $0x1f0] sm:$0xff]  ;;  %v339_v27 = vld [vmem:[#allocation5 + $0x3e0] sm:$0xff] }
  0x7f   : > { %729 = vmatpush1.bf16.msra.mxu0 %v728_v61  ;;  %667 = vmatprep.subr.bf16.mxu1 %v666_v62  ;;  %v338_v61 = vld [vmem:[#allocation5 + $0x3d8] sm:$0xff]  ;;  %v199_v62 = vrot.slane %v198_v53, 1  ;;  %v340_v14 = vld [vmem:[#allocation5 + $0x3e8] sm:$0xff]  ;;  %v193_v17 = vrot.slane %v192_v63, 1 }
  0x80   : > { %731 = vmatprep.subr.bf16.mxu0 %v730_v2  ;;  %v213_v1 = vrot.slane %v212_v58, 1  ;;  %v205_v2 = vrot.slane %v204_v47, 2  ;;  %v746_v9 = vpack.c.bf16 %v338_v61, %v336_v59 }
  0x82   : > { %669 = vmatpush1.bf16.msra.mxu1 %v668_v8  ;;  %v200_v8 = vadd.f32 %v199_v62, %v198_v53  ;;  %v214_v13 = vmax.f32 %v212_v58, %v213_v1  ;;  %v206_v20 = vmax.f32 %v204_v47, %v205_v2  ;;  %v499_v47 = vsub.s32 0, %v1125_v60 }
  0x83   : > { %733 = vmatpush1.bf16.msra.mxu0 %v732_v10  ;;  %671 = vmatprep.subr.bf16.mxu1 %v670_v11  ;;  %v337_v10 = vld [vmem:[#allocation5 + $0x3d0] sm:$0xff]  ;;  %v276_v11 = vld [vmem:[#allocation5 + $0x1e8] sm:$0xff] }
  0x84   : > { %735 = vmatprep.subr.bf16.mxu0 %v734_v15  ;;  %v342_v15 = vld [vmem:[#allocation5 + $0x3f8] sm:$0xff]  ;;  %v202_v16 = vmul.f32 0.25, %v200_v8  ;;  %478 = vmatprep.mubr.f32.mxu0 %v214_v13  ;;  %v748_v21 = vpack.c.bf16 %v337_v10, %v335_v7  ;;  %v686_v23 = vpack.c.bf16 %v278_v12, %v276_v11  ;;  %v207_v31 = vrot.slane %v206_v20, 1 }
  0x85   : > { %v750_v26 = vpack.c.bf16 %v342_v15, %v340_v14 }
  0x86   : > { %673 = vmatpush1.bf16.msra.mxu1 %v672_v24  ;;  %v275_v24 = vld [vmem:[#allocation5 + $0x1e0] sm:$0xff]  ;;  %407 = vmatprep.mubr.f32.mxu1 %v202_v16  ;;  %v208_v34 = vmax.f32 %v206_v20, %v207_v31 }
  0x87   : > { %737 = vmatpush1.bf16.msra.mxu0 %v736_v28  ;;  %675 = vmatprep.subr.bf16.mxu1 %v674_v29  ;;  %v341_v28 = vld [vmem:[#allocation5 + $0x3f0] sm:$0xff]  ;;  %v194_v29 = vadd.f32 %v193_v17, %v192_v63  ;;  %v688_v30 = vpack.c.bf16 %v277_v25, %v275_v24 }
  0x88   : > { %739 = vmatprep.subr.bf16.mxu0 %v738_v35  ;;  %v752_v32 = vpack.c.bf16 %v341_v28, %v339_v27 }
  0x89   : > { %v201_v33 = vmul.f32 0.25, %v194_v29 }
  0x8a   : > { %677 = vmatpush1.bf16.msra.mxu1 %v676_v44 }
  0x8b   : > { %741 = vmatpush1.bf16.msra.mxu0 %v740_v48  ;;  %679 = vmatprep.subr.bf16.mxu1 %v678_v49 }
  0x8c   : > { %743 = vmatprep.subr.bf16.mxu0 %v742_v54 }
  0x8e   : > { %681 = vmatpush1.bf16.msra.mxu1 %v680_v0 }
  0x8f   : > { %745 = vmatpush1.bf16.msra.mxu0 %v744_v3  ;;  %683 = vmatprep.subr.bf16.mxu1 %v682_v4 }
  0x90   : > { %747 = vmatprep.subr.bf16.mxu0 %v746_v9 }
  0x92   : > { %685 = vmatpush1.bf16.msra.mxu1 %v684_v19 }
  0x93   : > { %749 = vmatpush1.bf16.msra.mxu0 %v748_v21  ;;  %687 = vmatprep.subr.bf16.mxu1 %v686_v23 }
  0x94   : > { %751 = vmatprep.subr.bf16.mxu0 %v750_v26 }
  0x96   : > { %689 = vmatpush1.bf16.msra.mxu1 %v688_v30 }
  0x97   : > { %753 = vmatpush1.bf16.msra.mxu0 %v752_v32 }
  0x99   : > { %408 = vmatmul.mubr.f32.vlgmr.msra.gmra.mrb[0].mxu1 %v201_v33 }
  0x9a   : > { %479 = vmatmul.mubr.f32.vlgmr.msra.gmra.mrb[0].mxu0 %v208_v34 }
 0x16c   : > { %v409_v35 = vpop.f32.mrb[0].mxu1 }
 0x16d   : > { %v480_v36 = vpop.f32.mrb[0].mxu0  ;;  %v411_v37 = vpop.f32.mrb[1].mxu1 }
 0x16e   : > { %v481_v38 = vadd.f32 %v480_v36, %v409_v35  ;;  %v482_v39 = vpop.f32.mrb[1].mxu0 }
 0x16f   : > { %v483_v40 = vadd.f32 %v482_v39, %v411_v37 }
 0x170   : > { %v617_v41 = vmul.f32 -1.442695, %v481_v38 }
 0x171   : > { %v618_v42 = vmul.f32 -1.442695, %v483_v40 }
 0x172   : > { %815 = vpow2.f32 %v617_v41 }
 0x173   : > { %817 = vpow2.f32 %v618_v42 }
 0x17c   : > { %v816_v43 = vpop.eup %815 }
 0x17d   : > { %v818_v44 = vpop.eup %817  ;;  %v491_v45 = vadd.f32 1.0, %v816_v43 }
 0x17e   : > { %v492_v46 = vadd.f32 1.0, %v818_v44 }
 0x17f   : > { %819 = vrcp.f32 %v491_v45 }
 0x180   : > { %821 = vrcp.f32 %v492_v46 }
 0x189   : > { %v820_v48 = vpop.eup %819 }
 0x18a   : > { %v822_v49 = vpop.eup %821  ;;  %v500_v50 = vrot.slane %v820_v48, %v499_v47 }
 0x18b   : > { %v504_v51 = vrot.slane %v822_v49, %v499_v47 }
 0x18c   : > { %v505_v52 = vmul.f32 %v500_v50, %v1133_v22 }
 0x18d   : > { %v506_v53 = vmul.f32 %v504_v51, %v1129_v18 }
 0x18e   : > { %509 = vst [vmem:[%s174_s17] sm:$0xff] %v505_v52 }
 0x18f   : > { %510 = vst [vmem:[%s174_s17 + $0x8] sm:$0xff] %v506_v53 }
 0x190   : > { %894 = shalt.err (!%p891_p7)
}
 0x191   : > { %s895_s6 = scalar_lea.hbm %s1153_s28, 256  ;;  %s899_s24 = scalar_lea.hbm %s1199_s2, 512 }
 0x192   : > { %p896_p9 = scmp.ne.s32.totalorder %s1153_s28, %s895_s6  ;;  %p900_p0 = scmp.lt.u32.totalorder %s1153_s28, %s1199_s2 }
 0x193   : > { %p901_p11 = scmp.lt.u32.totalorder %s899_s24, %s895_s6  ;;  %p903_p4 = scmp.lt.u32.totalorder %s895_s6, %s1153_s28 }
 0x194   : > { %p897_p2 = pnand %p896_p9, %p1064_p12 }
 0x195   : > { %p902_p1 = por %p901_p11, %p900_p0 }
 0x196   : > { %p898_p5 = pneg %p897_p2 }
 0x197   : > { %p904_p6 = por %p903_p4, %p902_p1 }
 0x199   : > { %p905_p8 = pnand %p904_p6, %p898_p5 }
 0x19b   : > { %908 = shalt.err (!%p905_p8)
}
 0x19c   : > { %762 = dma.vmem_to_hbm [thread:$0]  (%p1064_p12), %s1155_s27, 256, %s1153_s28, %s512_s13  }
 0x19d PF: > { %s538_s26 = sand.u32 1, %s939_s9   ;;  %p1214_p10 = scmp.ne.s32.totalorder %s1204_s16, 0 }
 0x19e   : > { %p1215_p13 = scmp.ge.s32.totalorder %s951_s12, 2  ;;  %s539_s19 = scalar_lea.sflag [#allocation4], %s538_s26 }
 0x1a0   : > { %p773_p3 = pnand %p1215_p13, %p1214_p10 }
 0x1a2   : > { %934 = dma.done.wait (!%p773_p3), %s539_s19, 256  }
 0x1a3   : > { %936 = vsyncadd (!%p773_p3), %s539_s19, 4294967040  ;;  %p16_p7 = scmp.ge.s32.totalorder %s1029_s21, 4   ;;  %s1216_s9 = smov %s943_s10 }
 0x1a4   : > { %s1217_s10 = smov %s947_s11  ;;  %s1218_s11 = smov %s1060_s8 }
 0x1a5   : > { %s1219_s12 = smov %s1029_s21  ;;  %18 = sbr.rel (!%p16_p7) target bundleno = 6 (0x6), region = 79 }
 0x1ac   :  { %544 = vsyncpa [#allocation3], 1 }
 0x1ad   :  { %546 = vsyncpa [#allocation3 + $0x1], 1 }
 0x1ae   :  { %547 = vsyncpa [#allocation6], 1 }
 0x1af   :  { %548 = vsyncpa [#allocation4], 1 }
 0x1b0   :  { %550 = vsyncpa [#allocation4 + $0x1], 1 }

</bundles_post_ra>
